<compile_context>
chip_gen: v7x
topology: tpu7x:2x2x1
jax: 0.10.0
libtpu: 0.0.40
codegen_flags: <defaults>
</compile_context>

<pallas_src>
import functools

import jax
import jax.numpy as jnp
from jax import lax
from jax.experimental import pallas as pl
from jax.experimental.pallas import tpu as pltpu
import numpy as np


# --------------------------------------------------------------------------
# Kernels
# --------------------------------------------------------------------------

def _gram_kernel(feat_ref, w_ref, b_ref, out_ref, g_ref, *, compute_dtype):
    """feat_map = x @ (w @ w^T); Gram built once per model block."""
    # The data-tile axis (grid axis 1) is "arbitrary", so j == 0 runs before any
    # j > 0 for every model block on every core; the w block's index_map ignores
    # j, so the weights are DMA'd once per model block.
    @pl.when(pl.program_id(1) == 0)
    def _():
        w = w_ref[...].astype(compute_dtype)
        # G[m] = w[m] @ w[m]^T : contract the last dim of both operands ("NT"),
        # no transpose / extra VMEM copy of w.
        g_ref[...] = lax.dot_general(
            w, w,
            dimension_numbers=(((2,), (2,)), ((0,), (0,))),
            preferred_element_type=jnp.float32,
        )

    x = feat_ref[...].astype(compute_dtype)
    g = g_ref[...].astype(compute_dtype)
    feat_map = lax.dot_general(
        x, g,
        dimension_numbers=(((2,), (1,)), ((0,), (0,))),
        preferred_element_type=jnp.float32,
    )
    out_ref[...] = jnp.maximum(feat_map + b_ref[...], 0.0).astype(out_ref.dtype)


def _two_matmul_kernel(feat_ref, w_ref, b_ref, out_ref, *, compute_dtype):
    """Direct NN + NT formulation (used when f > 2*h, where it is cheaper)."""
    x = feat_ref[...].astype(compute_dtype)
    w = w_ref[...].astype(compute_dtype)
    hidden = lax.dot_general(
        x, w,
        dimension_numbers=(((2,), (1,)), ((0,), (0,))),
        preferred_element_type=jnp.float32,
    )
    feat_map = lax.dot_general(
        hidden.astype(compute_dtype), w,
        dimension_numbers=(((2,), (2,)), ((0,), (0,))),
        preferred_element_type=jnp.float32,
    )
    out_ref[...] = jnp.maximum(feat_map + b_ref[...], 0.0).astype(out_ref.dtype)


def _h_tiled_kernel(feat_ref, w_ref, b_ref, out_ref, acc_ref, *, compute_dtype):
    """Escape hatch for very large f*h weights: tile the hidden axis (grid
    axis 2) and accumulate feat_map in an f32 VMEM scratch."""
    k = pl.program_id(2)

    @pl.when(k == 0)
    def _():
        acc_ref[...] = jnp.zeros_like(acc_ref)

    x = feat_ref[...].astype(compute_dtype)
    w = w_ref[...].astype(compute_dtype)
    hidden = lax.dot_general(
        x, w,
        dimension_numbers=(((2,), (1,)), ((0,), (0,))),
        preferred_element_type=jnp.float32,
    )
    acc_ref[...] += lax.dot_general(
        hidden.astype(compute_dtype), w,
        dimension_numbers=(((2,), (2,)), ((0,), (0,))),
        preferred_element_type=jnp.float32,
    )

    @pl.when(k == pl.num_programs(2) - 1)
    def _():
        out_ref[...] = jnp.maximum(acc_ref[...] + b_ref[...], 0.0).astype(out_ref.dtype)


# --------------------------------------------------------------------------
# Tiling / planning helpers
# --------------------------------------------------------------------------

def _round_up(x, n):
    return ((x + n - 1) // n) * n


def _largest_divisor_at_most(n, cap):
    cap = max(1, min(n, cap))
    for c in range(cap, 0, -1):
        if n % c == 0:
            return c
    return 1


def _vmem_capacity_bytes():
    # Generation-aware: 128 MiB on v5e/v6e, 64 MiB per TensorCore on v7x.
    try:
        cap = int(pltpu.get_tpu_info().vmem_capacity_bytes)
        if cap > 0:
            return cap
    except Exception:
        pass
    return 64 << 20  # conservative default (v7x-sized)


def _pick_tile_d(d, cap):
    """Return (tile_d, d_padded): tile_d % 8 == 0 and tile_d divides d_padded."""
    cap = max(8, cap - cap % 8)
    if d <= cap:
        td = _round_up(d, 8)
        return td, td
    dp = _round_up(d, 8)
    for td in range(cap, 127, -8):          # prefer an exact divisor >= 128
        if dp % td == 0:
            return td, dp
    return cap, _round_up(d, cap)            # otherwise pad d up to the cap


def _pick_tile_h(h, th_cap):
    """Largest divisor of h that is a multiple of 128 and <= th_cap (or None)."""
    cap = min(h, th_cap)
    cap -= cap % 128
    for th in range(cap, 0, -128):
        if h % th == 0:
            return th
    return None


def _plan(m, d, f, h, itemsize, vmem_budget):
    use_gram = f <= 2 * h

    # Model block: divisor of m, at most 8 models per step; keep >= 2 model
    # blocks when m >= 2 so v7x's second TensorCore gets work (the model axis
    # is the only "parallel" grid axis).
    m_blk = _largest_divisor_at_most(m, 8)
    if m > 1 and m // m_blk < 2:
        m_blk = _largest_divisor_at_most(m, max(1, m_blk // 2))

    d_cap = 2048
    tile_h = h

    def footprint(mb, td, th):
        # Double-buffered feat-in / feat-out / w / b blocks (+ scratch / the
        # f32 hidden intermediate where applicable).
        io = 2 * itemsize * (2 * mb * td * f + mb * f * th + mb * f)
        if use_gram and th == h:
            extra = 4 * mb * f * f                 # Gram scratch
        elif th == h:
            extra = 4 * mb * td * h                # hidden intermediate
        else:
            extra = 4 * mb * td * (f + th)         # accumulator + hidden chunk
        return io + extra

    tile_d, d_pad = _pick_tile_d(d, d_cap)
    while footprint(m_blk, tile_d, tile_h) > vmem_budget and m_blk > 1:
        m_blk = _largest_divisor_at_most(m, m_blk // 2)
    while footprint(m_blk, tile_d, tile_h) > vmem_budget and tile_d > 8:
        d_cap = max(8, d_cap // 2)
        tile_d, d_pad = _pick_tile_d(d, d_cap)

    # Escape hatch for very large f*h weight blocks: tile the hidden axis.
    if footprint(m_blk, tile_d, tile_h) > vmem_budget and h > 128:
        th_cap = h // 2
        while footprint(m_blk, tile_d, tile_h) > vmem_budget:
            th = _pick_tile_h(h, th_cap)
            if th is None or th >= tile_h:
                # TODO(synk): h has no multiple-of-128 divisor small enough;
                # proceed and let the compiler report VMEM pressure clearly.
                break
            tile_h = th
            th_cap = th // 2

    return m_blk, tile_d, d_pad, tile_h, (use_gram and tile_h == h)


# --------------------------------------------------------------------------
# Wrapper
# --------------------------------------------------------------------------

def multimodel_forward(feat_3t, w_3t, b_3t, *, compute_dtype=jnp.float32):
    m, d, f = feat_3t.shape
    mw, fw, h = w_3t.shape
    assert (mw, fw) == (m, f) and b_3t.shape == (m, 1, f)

    itemsize = jnp.dtype(feat_3t.dtype).itemsize
    vmem_cap = _vmem_capacity_bytes()
    vmem_budget = (vmem_cap * 7) // 16      # ~28 MiB on v7x, ~56 MiB on v5e/v6e
    vmem_limit = (vmem_cap * 13) // 16      # ~52 MiB on v7x, ~104 MiB on v5e/v6e

    m_blk, tile_d, d_pad, tile_h, use_gram = _plan(
        m, d, f, h, itemsize, vmem_budget)

    x = feat_3t
    if d_pad != d:
        # Keep tiles sublane-aligned; padded rows are zeros -> relu(b) garbage
        # rows that we slice off below (no cross-row interaction).
        x = jnp.pad(x, ((0, 0), (0, d_pad - d), (0, 0)))

    out_shape = jax.ShapeDtypeStruct((m, d_pad, f), feat_3t.dtype)

    if use_gram:
        flops = 2 * m * f * f * h + 2 * m * d_pad * f * f
    else:
        flops = 4 * m * d_pad * f * h
    bytes_accessed = itemsize * (2 * m * d_pad * f + m * f * h + m * f)
    cost = pl.CostEstimate(flops=flops, bytes_accessed=bytes_accessed,
                           transcendentals=0)

    if tile_h == h:
        grid = (m // m_blk, d_pad // tile_d)
        kernel = functools.partial(
            _gram_kernel if use_gram else _two_matmul_kernel,
            compute_dtype=compute_dtype)
        in_specs = [
            pl.BlockSpec((m_blk, tile_d, f), lambda i, j: (i, j, 0)),
            # w / b index_maps ignore the data-tile index: each model block's
            # weights are DMA'd once and stay resident across its data tiles.
            pl.BlockSpec((m_blk, f, h), lambda i, j: (i, 0, 0)),
            pl.BlockSpec((m_blk, 1, f), lambda i, j: (i, 0, 0)),
        ]
        out_specs = pl.BlockSpec((m_blk, tile_d, f), lambda i, j: (i, j, 0))
        scratch_shapes = (
            [pltpu.VMEM((m_blk, f, f), jnp.float32)] if use_gram else [])
        # Data axis "arbitrary": required for the Gram j==0 dependency, and it
        # keeps megacore sharding on the model axis (full weight residency per
        # core).  Fall back to fully parallel only when there is a single model
        # block and no cross-step dependency.
        if use_gram or (m // m_blk) >= 2:
            dim_sem = ("parallel", "arbitrary")
        else:
            dim_sem = ("parallel", "parallel")
    else:
        grid = (m // m_blk, d_pad // tile_d, h // tile_h)
        kernel = functools.partial(_h_tiled_kernel, compute_dtype=compute_dtype)
        in_specs = [
            pl.BlockSpec((m_blk, tile_d, f), lambda i, j, k: (i, j, 0)),
            pl.BlockSpec((m_blk, f, tile_h), lambda i, j, k: (i, 0, k)),
            pl.BlockSpec((m_blk, 1, f), lambda i, j, k: (i, 0, 0)),
        ]
        out_specs = pl.BlockSpec((m_blk, tile_d, f), lambda i, j, k: (i, j, 0))
        scratch_shapes = [pltpu.VMEM((m_blk, tile_d, f), jnp.float32)]
        dim_sem = ("parallel", "arbitrary", "arbitrary")

    out = pl.pallas_call(
        kernel,
        out_shape=out_shape,
        grid_spec=pltpu.PrefetchScalarGridSpec(
            num_scalar_prefetch=0,
            grid=grid,
            in_specs=in_specs,
            out_specs=out_specs,
            scratch_shapes=scratch_shapes,
        ),
        compiler_params=pltpu.CompilerParams(
            dimension_semantics=dim_sem,
            vmem_limit_bytes=vmem_limit,
        ),
        cost_estimate=cost,
    )(x, w_3t, b_3t)

    if d_pad != d:
        out = out[:, :d, :]
    return out


# --------------------------------------------------------------------------
# Params / reference / test
# --------------------------------------------------------------------------

def init_params(key, n_model, n_feat, n_hidden):
    # Mirror nn.init.xavier_normal_ on a (n_model, n_feat, n_hidden) tensor:
    # fan_in = size(1) * prod(dims[2:]) = n_feat * n_hidden
    # fan_out = size(0) * prod(dims[2:]) = n_model * n_hidden
    fan_in = n_feat * n_hidden
    fan_out = n_model * n_hidden
    std = np.sqrt(2.0 / (fan_in + fan_out))
    w = jax.random.normal(key, (n_model, n_feat, n_hidden), dtype=jnp.float32) * std
    b = jnp.zeros((n_model, 1, n_feat), dtype=jnp.float32)
    return w, b


def _reference(feat_3t, w_3t, b_3t):
    hidden = jnp.einsum("mdf,mfh->dmh", feat_3t, w_3t)
    feat_map = jnp.einsum("dmh,mfh->mdf", hidden, w_3t)
    return jnp.maximum(feat_map + b_3t, 0.0)


if __name__ == "__main__":
    key = jax.random.PRNGKey(0)
    k_w, k_x, k_w2, k_x2 = jax.random.split(key, 4)

    # Primary shape (Gram-matrix path, f <= 2h).
    n_model, n_data, n_feat, n_hidden = 4, 8, 16, 32
    w_3t, b_3t = init_params(k_w, n_model, n_feat, n_hidden)
    feat_3t = jax.random.normal(k_x, (n_model, n_data, n_feat), dtype=jnp.float32)
    out = jax.block_until_ready(multimodel_forward(feat_3t, w_3t, b_3t))
    np.testing.assert_allclose(
        np.asarray(out), np.asarray(_reference(feat_3t, w_3t, b_3t)),
        rtol=1e-5, atol=1e-5)

    # Secondary shape: two-matmul path (f > 2h) + data-dim padding (d=10 -> 16).
    n_model2, n_data2, n_feat2, n_hidden2 = 4, 10, 32, 8
    w2, b2 = init_params(k_w2, n_model2, n_feat2, n_hidden2)
    feat2 = jax.random.normal(k_x2, (n_model2, n_data2, n_feat2), dtype=jnp.float32)
    out2 = jax.block_until_ready(multimodel_forward(feat2, w2, b2))
    np.testing.assert_allclose(
        np.asarray(out2), np.asarray(_reference(feat2, w2, b2)),
        rtol=1e-5, atol=1e-5)

    print("KERNEL_OK")
</pallas_src>

<mosaic_0001>
module attributes {stable_mosaic.version = 11 : i64} {
  func.func @_gram_kernel(%arg0: i32, %arg1: i32, %arg2: memref<2x8x16xf32, #tpu.memory_space<vmem>>, %arg3: memref<2x16x32xf32, #tpu.memory_space<vmem>>, %arg4: memref<2x1x16xf32, #tpu.memory_space<vmem>>, %arg5: memref<2x8x16xf32, #tpu.memory_space<vmem>>, %arg6: memref<2x16x16xf32, #tpu.memory_space<vmem>>) attributes {dimension_semantics = [#tpu.dimension_semantics<parallel>, #tpu.dimension_semantics<arbitrary>], iteration_bounds = array<i64: 2, 1>, scalar_prefetch = 0 : i64, scratch_operands = 1 : i64, tpu.core_type = #tpu.core_type<tc>, window_params = [{transform_indices = @transform_0, window_bounds = array<i64: 2, 8, 16>}, {transform_indices = @transform_1, window_bounds = array<i64: 2, 16, 32>}, {transform_indices = @transform_2, window_bounds = array<i64: 2, 1, 16>}, {transform_indices = @transform_3, window_bounds = array<i64: 2, 8, 16>}]} {
    %c0_i32 = arith.constant 0 : i32
    %0 = arith.cmpi eq, %arg1, %c0_i32 : i32
    %1 = arith.extui %0 : i1 to i32
    %c0_i32_0 = arith.constant 0 : i32
    %2 = arith.cmpi ne, %1, %c0_i32_0 : i32
    scf.if %2 {
      %c0_13 = arith.constant 0 : index
      %c0_14 = arith.constant 0 : index
      %c0_15 = arith.constant 0 : index
      %12 = vector.load %arg3[%c0_13, %c0_14, %c0_15] : memref<2x16x32xf32, #tpu.memory_space<vmem>>, vector<2x16x32xf32>
      %cst_16 = arith.constant dense<0.000000e+00> : vector<2x16x16xf32>
      %13 = tpu.matmul %12, %12, %cst_16 {dimension_numbers = #tpu.dot_dimension_numbers<[2], [2], [1], [1], [0, 0, 0, 1, 1, 1], [0], [0]>} : vector<2x16x32xf32>, vector<2x16x32xf32>, vector<2x16x16xf32> -> vector<2x16x16xf32>
      %c0_17 = arith.constant 0 : index
      %c0_18 = arith.constant 0 : index
      %c0_19 = arith.constant 0 : index
      %14 = vector.load %arg6[%c0_17, %c0_18, %c0_19] : memref<2x16x16xf32, #tpu.memory_space<vmem>>, vector<2x16x16xf32>
      tpu.vector_store %arg6[%c0_17, %c0_18, %c0_19], %13 {strides = array<i32>} : memref<2x16x16xf32, #tpu.memory_space<vmem>>, vector<2x16x16xf32>,
    } else {
    }
    %c0 = arith.constant 0 : index
    %c0_1 = arith.constant 0 : index
    %c0_2 = arith.constant 0 : index
    %3 = vector.load %arg2[%c0, %c0_1, %c0_2] : memref<2x8x16xf32, #tpu.memory_space<vmem>>, vector<2x8x16xf32>
    %c0_3 = arith.constant 0 : index
    %c0_4 = arith.constant 0 : index
    %c0_5 = arith.constant 0 : index
    %4 = vector.load %arg6[%c0_3, %c0_4, %c0_5] : memref<2x16x16xf32, #tpu.memory_space<vmem>>, vector<2x16x16xf32>
    %cst = arith.constant dense<0.000000e+00> : vector<2x8x16xf32>
    %5 = tpu.matmul %3, %4, %cst {dimension_numbers = #tpu.dot_dimension_numbers<[2], [1], [1], [2], [0, 0, 0, 1, 1, 2], [0], [0]>} : vector<2x8x16xf32>, vector<2x16x16xf32>, vector<2x8x16xf32> -> vector<2x8x16xf32>
    %c0_6 = arith.constant 0 : index
    %c0_7 = arith.constant 0 : index
    %c0_8 = arith.constant 0 : index
    %6 = vector.load %arg4[%c0_6, %c0_7, %c0_8] : memref<2x1x16xf32, #tpu.memory_space<vmem>>, vector<2x1x16xf32>
    %7 = vector.broadcast %6 : vector<2x1x16xf32> to vector<2x8x16xf32>
    %8 = arith.addf %5, %7 : vector<2x8x16xf32>
    %cst_9 = arith.constant 0.000000e+00 : f32
    %9 = vector.broadcast %cst_9 : f32 to vector<2x8x16xf32>
    %10 = arith.maximumf %8, %9 : vector<2x8x16xf32>
    %c0_10 = arith.constant 0 : index
    %c0_11 = arith.constant 0 : index
    %c0_12 = arith.constant 0 : index
    %11 = vector.load %arg5[%c0_10, %c0_11, %c0_12] : memref<2x8x16xf32, #tpu.memory_space<vmem>>, vector<2x8x16xf32>
    tpu.vector_store %arg5[%c0_10, %c0_11, %c0_12], %10 {strides = array<i32>} : memref<2x8x16xf32, #tpu.memory_space<vmem>>, vector<2x8x16xf32>,
    return
  }
  func.func @transform_0(%arg0: i32, %arg1: i32) -> (i32, i32, i32) {
    %c0_i32 = arith.constant 0 : i32
    %c0_i32_0 = arith.constant 0 : i32
    return %arg0, %arg1, %c0_i32 : i32, i32, i32
  }
  func.func @transform_1(%arg0: i32, %arg1: i32) -> (i32, i32, i32) {
    %c0_i32 = arith.constant 0 : i32
    %c0_i32_0 = arith.constant 0 : i32
    %c0_i32_1 = arith.constant 0 : i32
    return %arg0, %c0_i32, %c0_i32_0 : i32, i32, i32
  }
  func.func @transform_2(%arg0: i32, %arg1: i32) -> (i32, i32, i32) {
    %c0_i32 = arith.constant 0 : i32
    %c0_i32_0 = arith.constant 0 : i32
    %c0_i32_1 = arith.constant 0 : i32
    return %arg0, %c0_i32, %c0_i32_0 : i32, i32, i32
  }
  func.func @transform_3(%arg0: i32, %arg1: i32) -> (i32, i32, i32) {
    %c0_i32 = arith.constant 0 : i32
    %c0_i32_0 = arith.constant 0 : i32
    return %arg0, %arg1, %c0_i32 : i32, i32, i32
  }
}

</mosaic_0001>

<bundles_post_ra>
// kernel: tpu_custom_call.1
= control target key start
LH: loop header
LB: loop body
LE: loop exit
PB: predicated region body
PF: predicated region fallthrough
CT: control target
= control target key end

     0   :  { %8 = vsyncpa [#allocation4], 0  ;;  %s1348_s0 = inlined_call_operand.hbm [shape: f32[4,8,16], index: 0, kind: input, shape index: {}]   ;;  %s1349_s1 = inlined_call_operand.hbm [shape: f32[4,16,32], index: 1, kind: input, shape index: {}]   ;;  %s1350_s2 = inlined_call_operand.vmem [shape: f32[4,1,16], index: 2, kind: input, shape index: {}]   ;;  %s1351_s3 = inlined_call_operand.hbm [shape: f32[4,8,16], index: 3, kind: output, shape index: {}]  }
   0x1   :  { %10 = vsyncpa [#allocation4 + $0x1], 0 }
   0x2   :  { %11 = vsyncpa [#allocation7], 0 }
   0x3   :  { %13 = vsyncpa [#allocation7 + $0x1], 0 }
   0x4   :  { %14 = vsyncpa [#allocation5], 0 }
   0x5   :  { %16 = vsyncpa [#allocation5 + $0x1], 0  ;;  %s1097_s12 = smov 0   ;;  %s1099_s13 = smov 0  }
   0x6   :  { %s1101_s14 = smov 0   ;;  %s1103_s15 = smov 0  }
   0x7   :  { %s1105_s16 = smov 0   ;;  %s1107_s17 = smov 0  }
   0x8 LB: > { %s748_s18 = sadd.s32 4294967295, %s1065_s17   ;;  %s749_s19 = sadd.s32 4294967294, %s1065_s17   ;;  %s1065_s17 = sphi %s1107_s17, %s22_s17   ;;  %s1061_s16 = sphi %s1105_s16, %s1369_s16   ;;  %s1057_s15 = sphi %s1103_s15, %s1368_s15   ;;  %s1053_s14 = sphi %s1101_s14, %s1367_s14   ;;  %s1049_s13 = sphi %s1099_s13, %s1366_s13   ;;  %s1045_s12 = sphi %s1097_s12, %s1365_s12  }
   0x9   : > { %s34_s20 = sadd.s32 1, %s1061_s16  ;;  %s43_s21 = sadd.s32 1, %s1053_s14 }
   0xa   : > { %p36_p0 = scmp.ge.s32.totalorder %s34_s20, 2  ;;  %p50_p1 = scmp.ne.s32.totalorder %s1053_s14, %s1049_s13 }
   0xb   : > { %p51_p2 = scmp.eq.s32.totalorder %s1065_s17, 0  ;;  %p56_p3 = scmp.ne.s32.totalorder %s1049_s13, %s1045_s12 }
   0xc   : > { %s1371_s20 = smov (%p36_p0, %s34_s20), 0  ;;  %p57_p5 = scmp.eq.s32.totalorder %s748_s18, 0 }
   0xd   : > { %p1138_p4 = por %p51_p2, %p50_p1  ;;  %s38_s23 = ssub.s32 %s1061_s16, %s1371_s20 }
   0xe   : > { %p134_p6 = scmp.eq.s32.totalorder %s748_s18, 1  ;;  %p41_p7 = scmp.eq.s32.totalorder %s38_s23, 0 }
   0xf   : > { %p1144_p8 = por %p57_p5, %p56_p3  ;;  %p140_p10 = scmp.eq.s32.totalorder %s749_s19, 1 }
  0x10   : > { %p1148_p9 = por %p134_p6, %p50_p1  ;;  %p862_p13 = scmp.lt.s32.totalorder %s1065_s17, 2 }
  0x11   : > { %s1355_s24 = scalar_select %p1144_p8, 1, 0 }
  0x12   : > { %s1356_s25 = scalar_select %p1148_p9, 1, 0 }
  0x13   : > { %s1153_s26 = scalar_select %p41_p7, %s1053_s14, %s43_s21  }
  0x14   : > { %p1155_p11 = por %p140_p10, %p56_p3  ;;  %s1162_s28 = sand.u32 1, %s1053_s14  }
  0x15   : > { %s752_s29 = sshll.u32 %s1162_s28, 4  ;;  %s781_s30 = sshll.u32 %s1061_s16, 8 }
  0x16   : > { %s1357_s27 = scalar_select %p1155_p11, 1, 0 }
  0x17   : > { %s1169_s6 = scalar_lea.hbm %s1348_s0, %s781_s30  ;;  %s164_s7 = scalar_lea.vmem [#allocation3], %s752_s29 }
  0x18   : > { %s172_s8 = sshll.u32 %s164_s7, 4  ;;  %p1175_p0 = pnand %p862_p13, %p1138_p4  ;;  %s1171_s8 = int_to_ptr.vmem [resolvable:$true] %s172_s8 }
  0x19   : > { %s161_s10 = scalar_lea.sflag [#allocation4], %s1162_s28  ;;  %s919_s11 = scalar_lea.hbm %s1169_s6, 256 }
  0x1a   : > { %p920_p2 = scmp.ne.s32.totalorder %s1169_s6, %s919_s11  ;;  %p921_p3 = pneg %p1175_p0 }
  0x1b   : > { %s924_s21 = scalar_lea.hbm %s1348_s0, 512  ;;  %p925_p4 = scmp.lt.u32.totalorder %s1169_s6, %s1348_s0 }
  0x1c   : > { %p922_p5 = pnand %p921_p3, %p920_p2  ;;  %p926_p7 = scmp.lt.u32.totalorder %s924_s21, %s919_s11 }
  0x1d   : > { %p928_p13 = scmp.lt.u32.totalorder %s919_s11, %s1169_s6 }
  0x1e   : > { %p923_p6 = pneg %p922_p5  ;;  %p927_p10 = por %p926_p7, %p925_p4 }
  0x20   : > { %p929_p12 = por %p928_p13, %p927_p10 }
  0x22   : > { %p930_p1 = pnand %p929_p12, %p923_p6 }
  0x24   : > { %933 = shalt.err (!%p930_p1)
}
  0x25   : > { %s934_s29 = scalar_lea.vmem %s1171_s8, 256  ;;  %s1067_s30 = smov [#allocation3]  }
  0x26   : > { %p935_p2 = scmp.ne.s32.totalorder %s1171_s8, %s934_s29  ;;  %s939_s4 = sshll.u32 %s1067_s30, 4  ;;  %s940_s4 = int_to_ptr.vmem [resolvable:$false] %s939_s4 }
  0x27   : > { %s941_s5 = scalar_lea.vmem %s940_s4, 512  ;;  %p942_p9 = scmp.lt.s32.totalorder %s1171_s8, %s940_s4 }
  0x28   : > { %p937_p5 = pnand %p935_p2, %p921_p3  ;;  %p943_p4 = scmp.lt.s32.totalorder %s941_s5, %s934_s29 }
  0x2a   : > { %p938_p11 = pneg %p937_p5  ;;  %p944_p7 = por %p943_p4, %p942_p9 }
  0x2c   : > { %p945_p10 = pnand %p944_p7, %p938_p11 }
  0x2e   : > { %948 = shalt.err (!%p945_p10)
}
  0x2f   : > { %s1068_s7 = smov 128   ;;  %s1069_s11 = smov 8  }
  0x30   : > { %854 = dma.hbm_to_vmem [thread:$0]  (!%p1175_p0), %s1169_s6, 256, %s1171_s8, %s161_s10, %s1068_s7, %s1068_s7, %s1069_s11  }
  0x31   : > { %p210_p9 = scmp.lt.s32.totalorder %s1065_s17, 3  ;;  %s755_s18 = sshll.u32 %s1162_s28, 5 }
  0x32   : > { %s783_s19 = sshll.u32 %s1061_s16, 9  ;;  %p1359_p11 = scmp.ge.s32.totalorder %s1065_s17, 1 }
  0x33   : > { %s1223_s29 = scalar_lea.hbm %s1349_s1, %s783_s19  ;;  %s186_s30 = scalar_lea.vmem [#allocation6], %s755_s18 }
  0x34   : > { %p1216_p12 = pnand %p1359_p11, %p210_p9  ;;  %s194_s4 = sshll.u32 %s186_s30, 4  ;;  %s1225_s4 = int_to_ptr.vmem [resolvable:$true] %s194_s4 }
  0x35   : > { %s183_s6 = scalar_lea.sflag [#allocation7], %s1162_s28  ;;  %s949_s8 = scalar_lea.hbm %s1223_s29, 512 }
  0x36   : > { %p950_p1 = scmp.ne.s32.totalorder %s1223_s29, %s949_s8  ;;  %s954_s19 = scalar_lea.hbm %s1349_s1, 1024 }
  0x37   : > { %p955_p2 = scmp.lt.u32.totalorder %s1223_s29, %s1349_s1  ;;  %p956_p5 = scmp.lt.u32.totalorder %s954_s19, %s949_s8 }
  0x38   : > { %p952_p6 = pnand %p950_p1, %p921_p3  ;;  %p958_p7 = scmp.lt.u32.totalorder %s949_s8, %s1223_s29 }
  0x39   : > { %p957_p4 = por %p956_p5, %p955_p2 }
  0x3a   : > { %p953_p13 = pneg %p952_p6 }
  0x3b   : > { %p959_p10 = por %p958_p7, %p957_p4 }
  0x3d   : > { %p960_p9 = pnand %p959_p10, %p953_p13 }
  0x3f   : > { %963 = shalt.err (!%p960_p9)
}
  0x40   : > { %s964_s18 = scalar_lea.vmem %s1225_s4, 512  ;;  %s1070_s30 = smov [#allocation6]  }
  0x41   : > { %p965_p11 = scmp.ne.s32.totalorder %s1225_s4, %s964_s18  ;;  %s969_s10 = sshll.u32 %s1070_s30, 4  ;;  %s970_s10 = int_to_ptr.vmem [resolvable:$false] %s969_s10 }
  0x42   : > { %s971_s5 = scalar_lea.vmem %s970_s10, 1024  ;;  %p972_p8 = scmp.lt.s32.totalorder %s1225_s4, %s970_s10 }
  0x43   : > { %p967_p1 = pnand %p965_p11, %p921_p3  ;;  %p973_p2 = scmp.lt.s32.totalorder %s971_s5, %s964_s18 }
  0x45   : > { %p968_p6 = pneg %p967_p1  ;;  %p974_p5 = por %p973_p2, %p972_p8 }
  0x47   : > { %p975_p4 = pnand %p974_p5, %p968_p6 }
  0x49   : > { %978 = shalt.err (!%p975_p4)
}
  0x4a   : > { %857 = dma.hbm_to_vmem [thread:$0]  (!%p1175_p0), %s1223_s29, 512, %s1225_s4, %s183_s6, %s1068_s7, %s1068_s7, %s1069_s11  }
  0x4b   : > { %214 = sbr.rel (%p1216_p12) target bundleno = 555 (0x22b), region = 32  ;;  %s1259_s8 = sand.u32 (!%p1216_p12), 1, %s1049_s13  }
  0x4c   : > { %s760_s19 = sshll.u32 (!%p1216_p12), %s1259_s8, 4  ;;  %s217_s9 = scalar_lea.sflag (!%p1216_p12), [#allocation4], %s1259_s8 }
  0x4d   : > { %s1265_s22 = scalar_lea.vmem (!%p1216_p12), [#allocation3], %s760_s19  ;;  %p1361_p8 = scmp.ne.s32.totalorder (!%p1216_p12), %s1355_s24, 0 }
  0x52   : > { %1032 = dma.done.wait (%p1361_p8), %s217_s9, 256  }
  0x53   : > { %1034 = vsyncadd (%p1361_p8), %s217_s9, 4294967040  ;;  %s761_s28 = sshll.u32 %s1259_s8, 5  ;;  %s226_s7 = scalar_lea.sflag [#allocation7], %s1259_s8 }
  0x54   : > { %s229_s11 = scalar_lea.vmem [#allocation6], %s761_s28 }
  0x55   : > { %1036 = dma.done.wait (%p1361_p8), %s226_s7, 512  }
  0x56   : > { %1038 = vsyncadd (%p1361_p8), %s226_s7, 4294966784  ;;  %vm277_vm0 = vcmask 261120   ;;  %v273_v0 = vld [vmem:[%s229_s11] sm:$0xff]  ;;  %v274_v1 = vld [vmem:[%s229_s11 + $0x8] sm:$0xff]  ;;  %v1071_v6 = vmov 0.0|0.0   ;;  %vm1072_vm2 = vmmov 0  }
  0x57   : > { %vm828_vm1 = vmpackc.low %vm277_vm0, %vm277_vm0  ;;  %v275_v2 = vld [vmem:[%s229_s11 + $0x10] sm:$0xff]  ;;  %v827_v3 = vpack.c.bf16 %v274_v1, %v273_v0  ;;  %v276_v4 = vld [vmem:[%s229_s11 + $0x18] sm:$0xff]  ;;  %803 = vmatprep.mubr.msk.f32.mxu0 %vm277_vm0, %v273_v0  ;;  %v1073_v7 = vmov 0.0   ;;  %vm440_vm3 = vcmask 130048   ;;  %s763_s24 = sshll.u32 %s1057_s15, 1  ;;  %s260_s6 = scalar_lea.vmem [#allocation8], %s760_s19 }
  0x58   : > { %810 = vmatprep.mubr.msk.f32.mxu1 %vm277_vm0, %v275_v2  ;;  %v833_v5 = vpack.c.bf16 %v276_v4, %v275_v2  ;;  %v445_v18 = vld [vmem:[%s1265_s22] sm:$0xff]  ;;  %v446_v19 = vld [vmem:[%s1265_s22 + $0x8] sm:$0xff]  ;;  %p264_p0 = scmp.lt.s32.totalorder %s763_s24, 3  ;;  %s631_s23 = sshll.u32 %s260_s6, 4  ;;  %s1297_s23 = int_to_ptr.vmem [resolvable:$true] %s631_s23 }
  0x59   : > { %829 = vmatprep.subr.msk.bf16.mxu0 %vm828_vm1, %v827_v3  ;;  %s784_s18 = sshll.u32 %s1057_s15, 8  ;;  %s617_s15 = scalar_lea.sflag [#allocation5], %s1259_s8 }
  0x5a   : > { %835 = vmatprep.subr.msk.bf16.mxu1 %vm828_vm1, %v833_v5  ;;  %832 = vmatpush3.bf16.xpose.msk.msra.mxu0 %vm828_vm1, %v827_v3  ;;  %s1373_s24 = smov (!%p264_p0, %s763_s24), 3  ;;  %s1295_s5 = scalar_lea.hbm %s1351_s3, %s784_s18 }
  0x5b   : > { %838 = vmatpush3.bf16.xpose.msk.msra.mxu1 %vm828_vm1, %v833_v5  ;;  %839 = vmatprep.subr.bf16.mxu0 %v1071_v6  ;;  %s266_s4 = scalar_lea.vmem %s1350_s2, %s1373_s24  ;;  %s979_s19 = scalar_lea.vmem %s1297_s23, 256 }
  0x5c   : > { %842 = vmatprep.subr.bf16.mxu1 %v1071_v6  ;;  %v772_v20 = vld [vmem:[%s266_s4] ss:$0 sm:$0xff]  ;;  %v773_v21 = vld [vmem:[%s266_s4 + $0x1] ss:$0 sm:$0xff]  ;;  %p980_p3 = scmp.ne.s32.totalorder %s1297_s23, %s979_s19  ;;  %p1362_p12 = scmp.ne.s32.totalorder %s1356_s25, 0 }
  0x5d   : > { %s1074_s9 = smov [#allocation8]  }
  0x5e   : > { %p981_p13 = pnand %p980_p3, %p1362_p12  ;;  %s983_s22 = sshll.u32 %s1074_s9, 4  ;;  %s984_s22 = int_to_ptr.vmem [resolvable:$false] %s983_s22 }
  0x5f   : > { %s985_s28 = scalar_lea.vmem %s984_s22, 512  ;;  %p986_p10 = scmp.lt.s32.totalorder %s1297_s23, %s984_s22 }
  0x60   : > { %p982_p7 = pneg %p981_p13  ;;  %p987_p9 = scmp.lt.s32.totalorder %s985_s28, %s979_s19 }
  0x61   : > { %804 = vmatmul.mubr.msk.f32.vlgmr.msra.gmra.mrb[0].mxu0 %vm277_vm0, %v274_v1 }
  0x62   : > { %811 = vmatmul.mubr.msk.f32.vlgmr.msra.gmra.mrb[0].mxu1 %vm277_vm0, %v276_v4  ;;  %817 = vmatprep.mubr.msk.f32.mxu0 %vm1072_vm2, %v1073_v7  ;;  %p988_p11 = por %p987_p9, %p986_p10 }
  0x63   : > { %824 = vmatprep.mubr.msk.f32.mxu1 %vm1072_vm2, %v1073_v7 }
  0x64   : > { %p989_p1 = pnand %p988_p11, %p982_p7 }
 0x134   : > { %v805_v8 = vpop.f32.mrb[0].mxu0 }
 0x135   : > { %442 = vst.msk [vmem:[#allocation2 + $0x8] sm:$0xff] %vm440_vm3, %v805_v8  ;;  %v812_v9 = vpop.f32.mrb[0].mxu1  ;;  %v350_v10 = vpop.f32.mrb[1].mxu0 }
 0x136   : > { %444 = vst.msk [vmem:[#allocation2 + $0x18] sm:$0xff] %vm440_vm3, %v812_v9  ;;  %441 = vst.msk [vmem:[#allocation2] sm:$0xff] %vm440_vm3, %v350_v10  ;;  %v431_v11 = vpop.f32.mrb[1].mxu1 }
 0x137   : > { %443 = vst.msk [vmem:[#allocation2 + $0x10] sm:$0xff] %vm440_vm3, %v431_v11 }
 0x13c   : > { %v448_v12 = vld [vmem:[#allocation2 + $0x8] sm:$0xff] }
 0x13d   : > { %v447_v13 = vld [vmem:[#allocation2] sm:$0xff]  ;;  %v450_v14 = vld [vmem:[#allocation2 + $0x18] sm:$0xff] }
 0x13e   : > { %v840_v15 = vpack.c.bf16 %v448_v12, %v447_v13  ;;  %v449_v16 = vld [vmem:[#allocation2 + $0x10] sm:$0xff] }
 0x13f   : > { %v843_v17 = vpack.c.bf16 %v450_v14, %v449_v16 }
 0x140   : > { %841 = vmatpush3.bf16.msra.mxu0 %v840_v15 }
 0x141   : > { %844 = vmatpush3.bf16.msra.mxu1 %v843_v17 }
 0x143   : > { %818 = vmatmul.mubr.msk.f32.vlgmr.msra.gmra.mrb[2].mxu0 %vm440_vm3, %v445_v18 }
 0x144   : > { %825 = vmatmul.mubr.msk.f32.vlgmr.msra.gmra.mrb[2].mxu1 %vm440_vm3, %v446_v19 }
 0x216   : > { %v535_v22 = vpop.f32.mrb[2].mxu0 }
 0x217   : > { %v536_v23 = vadd.f32 %v772_v20, %v535_v22  ;;  %v608_v24 = vpop.f32.mrb[2].mxu1  ;;  %v819_v25 = vpop.f32.mrb[3].mxu0 }
 0x218   : > { %v609_v26 = vadd.f32 %v773_v21, %v608_v24  ;;  %v826_v27 = vpop.f32.mrb[3].mxu1 }
 0x219   : > { %v612_v28 = vmax.f32 %v536_v23, 0.0 }
 0x21a   : > { %v613_v29 = vmax.f32 %v609_v26, 0.0 }
 0x21b   : > { %614 = vst.msk [vmem:[%s260_s6] sm:$0xff] %vm440_vm3, %v612_v28 }
 0x21c   : > { %615 = vst.msk [vmem:[%s260_s6 + $0x8] sm:$0xff] %vm440_vm3, %v613_v29 }
 0x21d   : > { %992 = shalt.err (!%p989_p1)
}
 0x21e   : > { %s993_s7 = scalar_lea.hbm %s1295_s5, 256  ;;  %s997_s21 = scalar_lea.hbm %s1351_s3, 512 }
 0x21f   : > { %p994_p6 = scmp.ne.s32.totalorder %s1295_s5, %s993_s7  ;;  %p998_p4 = scmp.lt.u32.totalorder %s1295_s5, %s1351_s3 }
 0x220   : > { %p999_p8 = scmp.lt.u32.totalorder %s997_s21, %s993_s7  ;;  %p1001_p3 = scmp.lt.u32.totalorder %s993_s7, %s1295_s5 }
 0x221   : > { %p995_p2 = pnand %p994_p6, %p1362_p12 }
 0x222   : > { %p1000_p0 = por %p999_p8, %p998_p4 }
 0x223   : > { %p996_p5 = pneg %p995_p2 }
 0x224   : > { %p1002_p13 = por %p1001_p3, %p1000_p0 }
 0x226   : > { %p1003_p7 = pnand %p1002_p13, %p996_p5 }
 0x228   : > { %1006 = shalt.err (!%p1003_p7)
}
 0x229   : > { %s1075_s6 = smov 128   ;;  %s1076_s18 = smov 8  }
 0x22a   : > { %849 = dma.vmem_to_hbm [thread:$0]  (%p1362_p12), %s1297_s23, 256, %s1295_s5, %s617_s15, %s1075_s6, %s1075_s6, %s1076_s18  }
 0x22b PF: > { %s646_s30 = sand.u32 1, %s1045_s12   ;;  %p1363_p10 = scmp.ne.s32.totalorder %s1357_s27, 0 }
 0x22c   : > { %p1364_p9 = scmp.ge.s32.totalorder %s1065_s17, 2  ;;  %s647_s10 = scalar_lea.sflag [#allocation5], %s646_s30 }
 0x22e   : > { %p859_p11 = pnand %p1364_p9, %p1363_p10 }
 0x230   : > { %1040 = dma.done.wait (!%p859_p11), %s647_s10, 256  }
 0x231   : > { %1042 = vsyncadd (!%p859_p11), %s647_s10, 4294967040  ;;  %s22_s17 = sadd.s32 1, %s1065_s17   ;;  %s1365_s12 = smov %s1049_s13 }
 0x232   : > { %p19_p1 = scmp.ge.s32.totalorder %s22_s17, 4   ;;  %s1366_s13 = smov %s1053_s14 }
 0x233   : > { %s1367_s14 = smov %s1153_s26  ;;  %s1368_s15 = smov %s1061_s16 }
 0x234   : > { %s1369_s16 = smov %s1371_s20  ;;  %21 = sbr.rel (!%p19_p1) target bundleno = 8 (0x8), region = 97 }
 0x23b   :  { %652 = vsyncpa [#allocation4], 1 }
 0x23c   :  { %654 = vsyncpa [#allocation4 + $0x1], 1 }
 0x23d   :  { %655 = vsyncpa [#allocation7], 1 }
 0x23e   :  { %657 = vsyncpa [#allocation7 + $0x1], 1 }
 0x23f   :  { %658 = vsyncpa [#allocation5], 1 }
 0x240   :  { %660 = vsyncpa [#allocation5 + $0x1], 1 }

</bundles_post_ra>
